<compile_context>
chip_gen: v5e
topology: v5e:2x2
jax: 0.10.0
libtpu: 0.0.40
codegen_flags: <defaults>
</compile_context>

<pallas_src>
import numpy as np
import jax
import jax.numpy as jnp
from jax import lax
from jax.experimental import pallas as pl
from jax.experimental.pallas import tpu as pltpu

_LANES = 128


def _default_params():
    """Deterministic init matching the PyTorch module's parameters."""
    matrix = np.array(
        [[0.299, 0.587, 0.114],
         [-0.168736, -0.331264, 0.5],
         [0.5, -0.418688, -0.081312]], dtype=np.float32).T        # (3, 3)
    shift = np.array([0.0, 128.0, 128.0], dtype=np.float32)       # (3,)
    return jnp.asarray(matrix), jnp.asarray(shift)


# ---------------- Pallas kernel ----------------
def _rgb_to_ycbcr_kernel(x_ref, m_ref, s_ref, o_ref):
    # x_ref / o_ref block: (1, 3, TR, 128) -- channel-planar, lane-dense.
    # m_ref: (9,) row-major flattened matrix in SMEM, s_ref: (3,) shift in SMEM.
    r = x_ref[0, 0, :, :].astype(jnp.float32)
    g = x_ref[0, 1, :, :].astype(jnp.float32)
    b = x_ref[0, 2, :, :].astype(jnp.float32)
    # out[..., k] = sum_c x[..., c] * matrix[c, k] + shift[k]   (matrix[c,k] = m_ref[3*c + k])
    o_ref[0, 0, :, :] = r * m_ref[0] + g * m_ref[3] + b * m_ref[6] + s_ref[0]
    o_ref[0, 1, :, :] = r * m_ref[1] + g * m_ref[4] + b * m_ref[7] + s_ref[1]
    o_ref[0, 2, :, :] = r * m_ref[2] + g * m_ref[5] + b * m_ref[8] + s_ref[2]


# ---------------- wrapper ----------------
def rgb_to_ycbcr(x, matrix=None, shift=None, *, max_tile_rows=1024):
    """Pallas equivalent of _RGBToYCbCr.forward.

    x:      (B, 3, H, W) real dtype (computed in float32, like the f32 parameters)
    matrix: (3, 3) float32 (defaults to the module's init)
    shift:  (3,)  float32 (defaults to [0, 128, 128])
    returns (B, H, W, 3) float32  -- same as the PyTorch module (channels-last).
    """
    if matrix is None or shift is None:
        dm, ds = _default_params()
        matrix = dm if matrix is None else matrix
        shift = ds if shift is None else shift

    B, C, H, W = x.shape
    assert C == 3, "RGB input expected"
    HW = H * W

    # Lane-dense tiling of the flattened spatial axis.
    rows0 = pl.cdiv(HW, _LANES)
    if rows0 <= max_tile_rows:
        tr, rows = rows0, rows0            # full slab (block dim == full array dim)
    else:
        tr = max_tile_rows                 # multiple of 8 by construction
        rows = pl.cdiv(rows0, tr) * tr
    pad = rows * _LANES - HW

    xp = x.reshape(B, 3, HW)
    if pad:
        xp = jnp.pad(xp, ((0, 0), (0, 0), (0, pad)))
    xp = xp.reshape(B, 3, rows, _LANES)

    m_flat = jnp.asarray(matrix, jnp.float32).reshape(9)
    s_vec = jnp.asarray(shift, jnp.float32).reshape(3)

    out = pl.pallas_call(
        _rgb_to_ycbcr_kernel,
        out_shape=jax.ShapeDtypeStruct((B, 3, rows, _LANES), jnp.float32),
        grid=(B, rows // tr),
        in_specs=[
            # lane-dense (1, 3, TR, 128) tile per grid step
            pl.BlockSpec((1, 3, tr, _LANES), lambda b, t: (b, 0, t, 0)),
            # 3x3 matrix (flattened) and shift: tiny scalar tables in SMEM
            pl.BlockSpec(memory_space=pltpu.MemorySpace.SMEM),
            pl.BlockSpec(memory_space=pltpu.MemorySpace.SMEM),
        ],
        out_specs=pl.BlockSpec((1, 3, tr, _LANES), lambda b, t: (b, 0, t, 0)),
        compiler_params=pltpu.CompilerParams(
            dimension_semantics=("parallel", "parallel")),
    )(xp, m_flat, s_vec)

    # Layout plumbing back to the module's channels-last output (outside the kernel).
    out = out.reshape(B, 3, rows * _LANES)[:, :, :HW].reshape(B, 3, H, W)
    return jnp.transpose(out, (0, 2, 3, 1))


# ---------------- reference (pure JAX, mirrors PyTorch semantics) ----------------
def _ref(x, matrix, shift):
    xt = jnp.transpose(x.astype(jnp.float32), (0, 2, 3, 1))      # permute(0,2,3,1)
    out = jnp.einsum("bhwc,ck->bhwk", xt, matrix,
                     precision=lax.Precision.HIGHEST) + shift     # tensordot + shift
    return out                                                    # (B, H, W, 3)


if __name__ == "__main__":
    key = jax.random.PRNGKey(0)
    B, C, H, W = 2, 3, 16, 16
    x = jax.random.uniform(key, (B, C, H, W), dtype=jnp.float32) * 255.0
    matrix, shift = _default_params()

    out = jax.block_until_ready(rgb_to_ycbcr(x, matrix, shift))
    ref = _ref(x, matrix, shift)

    assert out.shape == (B, H, W, 3) and out.dtype == jnp.float32
    np.testing.assert_allclose(np.asarray(out), np.asarray(ref), rtol=1e-5, atol=1e-4)

    print("KERNEL_OK")
</pallas_src>

<mosaic_0001>
module attributes {stable_mosaic.version = 11 : i64} {
  func.func @_rgb_to_ycbcr_kernel(%arg0: i32, %arg1: i32, %arg2: memref<1x3x2x128xf32, #tpu.memory_space<vmem>>, %arg3: memref<9xf32, #tpu.memory_space<smem>>, %arg4: memref<3xf32, #tpu.memory_space<smem>>, %arg5: memref<1x3x2x128xf32, #tpu.memory_space<vmem>>) attributes {dimension_semantics = [#tpu.dimension_semantics<parallel>, #tpu.dimension_semantics<parallel>], iteration_bounds = array<i64: 2, 1>, scalar_prefetch = 0 : i64, scratch_operands = 0 : i64, tpu.core_type = #tpu.core_type<tc>, window_params = [{transform_indices = @transform_0, window_bounds = array<i64: 1, 3, 2, 128>}, {transform_indices = @transform_1, window_bounds = array<i64: 9>}, {transform_indices = @transform_2, window_bounds = array<i64: 3>}, {transform_indices = @transform_3, window_bounds = array<i64: 1, 3, 2, 128>}]} {
    %c0 = arith.constant 0 : index
    %c0_0 = arith.constant 0 : index
    %c0_1 = arith.constant 0 : index
    %c0_2 = arith.constant 0 : index
    %0 = vector.load %arg2[%c0, %c0_0, %c0_1, %c0_2] : memref<1x3x2x128xf32, #tpu.memory_space<vmem>>, vector<1x1x2x128xf32>
    %1 = vector.shape_cast %0 : vector<1x1x2x128xf32> to vector<2x128xf32>
    %c0_3 = arith.constant 0 : index
    %c1 = arith.constant 1 : index
    %c0_4 = arith.constant 0 : index
    %c0_5 = arith.constant 0 : index
    %2 = vector.load %arg2[%c0_3, %c1, %c0_4, %c0_5] : memref<1x3x2x128xf32, #tpu.memory_space<vmem>>, vector<1x1x2x128xf32>
    %3 = vector.shape_cast %2 : vector<1x1x2x128xf32> to vector<2x128xf32>
    %c0_6 = arith.constant 0 : index
    %c2 = arith.constant 2 : index
    %c0_7 = arith.constant 0 : index
    %c0_8 = arith.constant 0 : index
    %4 = vector.load %arg2[%c0_6, %c2, %c0_7, %c0_8] : memref<1x3x2x128xf32, #tpu.memory_space<vmem>>, vector<1x1x2x128xf32>
    %5 = vector.shape_cast %4 : vector<1x1x2x128xf32> to vector<2x128xf32>
    %c0_9 = arith.constant 0 : index
    %6 = memref.load %arg3[%c0_9] : memref<9xf32, #tpu.memory_space<smem>>
    %7 = vector.broadcast %6 : f32 to vector<2x128xf32>
    %8 = arith.mulf %1, %7 : vector<2x128xf32>
    %c3 = arith.constant 3 : index
    %9 = memref.load %arg3[%c3] : memref<9xf32, #tpu.memory_space<smem>>
    %10 = vector.broadcast %9 : f32 to vector<2x128xf32>
    %11 = arith.mulf %3, %10 : vector<2x128xf32>
    %12 = arith.addf %8, %11 : vector<2x128xf32>
    %c6 = arith.constant 6 : index
    %13 = memref.load %arg3[%c6] : memref<9xf32, #tpu.memory_space<smem>>
    %14 = vector.broadcast %13 : f32 to vector<2x128xf32>
    %15 = arith.mulf %5, %14 : vector<2x128xf32>
    %16 = arith.addf %12, %15 : vector<2x128xf32>
    %c0_10 = arith.constant 0 : index
    %17 = memref.load %arg4[%c0_10] : memref<3xf32, #tpu.memory_space<smem>>
    %18 = vector.broadcast %17 : f32 to vector<2x128xf32>
    %19 = arith.addf %16, %18 : vector<2x128xf32>
    %c0_11 = arith.constant 0 : index
    %c0_12 = arith.constant 0 : index
    %c0_13 = arith.constant 0 : index
    %c0_14 = arith.constant 0 : index
    %20 = vector.load %arg5[%c0_11, %c0_12, %c0_13, %c0_14] : memref<1x3x2x128xf32, #tpu.memory_space<vmem>>, vector<1x1x2x128xf32>
    %21 = vector.shape_cast %20 : vector<1x1x2x128xf32> to vector<2x128xf32>
    %22 = vector.shape_cast %19 : vector<2x128xf32> to vector<1x1x2x128xf32>
    tpu.vector_store %arg5[%c0_11, %c0_12, %c0_13, %c0_14], %22 {strides = array<i32>} : memref<1x3x2x128xf32, #tpu.memory_space<vmem>>, vector<1x1x2x128xf32>,
    %c1_15 = arith.constant 1 : index
    %23 = memref.load %arg3[%c1_15] : memref<9xf32, #tpu.memory_space<smem>>
    %24 = vector.broadcast %23 : f32 to vector<2x128xf32>
    %25 = arith.mulf %1, %24 : vector<2x128xf32>
    %c4 = arith.constant 4 : index
    %26 = memref.load %arg3[%c4] : memref<9xf32, #tpu.memory_space<smem>>
    %27 = vector.broadcast %26 : f32 to vector<2x128xf32>
    %28 = arith.mulf %3, %27 : vector<2x128xf32>
    %29 = arith.addf %25, %28 : vector<2x128xf32>
    %c7 = arith.constant 7 : index
    %30 = memref.load %arg3[%c7] : memref<9xf32, #tpu.memory_space<smem>>
    %31 = vector.broadcast %30 : f32 to vector<2x128xf32>
    %32 = arith.mulf %5, %31 : vector<2x128xf32>
    %33 = arith.addf %29, %32 : vector<2x128xf32>
    %c1_16 = arith.constant 1 : index
    %34 = memref.load %arg4[%c1_16] : memref<3xf32, #tpu.memory_space<smem>>
    %35 = vector.broadcast %34 : f32 to vector<2x128xf32>
    %36 = arith.addf %33, %35 : vector<2x128xf32>
    %c0_17 = arith.constant 0 : index
    %c1_18 = arith.constant 1 : index
    %c0_19 = arith.constant 0 : index
    %c0_20 = arith.constant 0 : index
    %37 = vector.load %arg5[%c0_17, %c1_18, %c0_19, %c0_20] : memref<1x3x2x128xf32, #tpu.memory_space<vmem>>, vector<1x1x2x128xf32>
    %38 = vector.shape_cast %37 : vector<1x1x2x128xf32> to vector<2x128xf32>
    %39 = vector.shape_cast %36 : vector<2x128xf32> to vector<1x1x2x128xf32>
    tpu.vector_store %arg5[%c0_17, %c1_18, %c0_19, %c0_20], %39 {strides = array<i32>} : memref<1x3x2x128xf32, #tpu.memory_space<vmem>>, vector<1x1x2x128xf32>,
    %c2_21 = arith.constant 2 : index
    %40 = memref.load %arg3[%c2_21] : memref<9xf32, #tpu.memory_space<smem>>
    %41 = vector.broadcast %40 : f32 to vector<2x128xf32>
    %42 = arith.mulf %1, %41 : vector<2x128xf32>
    %c5 = arith.constant 5 : index
    %43 = memref.load %arg3[%c5] : memref<9xf32, #tpu.memory_space<smem>>
    %44 = vector.broadcast %43 : f32 to vector<2x128xf32>
    %45 = arith.mulf %3, %44 : vector<2x128xf32>
    %46 = arith.addf %42, %45 : vector<2x128xf32>
    %c8 = arith.constant 8 : index
    %47 = memref.load %arg3[%c8] : memref<9xf32, #tpu.memory_space<smem>>
    %48 = vector.broadcast %47 : f32 to vector<2x128xf32>
    %49 = arith.mulf %5, %48 : vector<2x128xf32>
    %50 = arith.addf %46, %49 : vector<2x128xf32>
    %c2_22 = arith.constant 2 : index
    %51 = memref.load %arg4[%c2_22] : memref<3xf32, #tpu.memory_space<smem>>
    %52 = vector.broadcast %51 : f32 to vector<2x128xf32>
    %53 = arith.addf %50, %52 : vector<2x128xf32>
    %c0_23 = arith.constant 0 : index
    %c2_24 = arith.constant 2 : index
    %c0_25 = arith.constant 0 : index
    %c0_26 = arith.constant 0 : index
    %54 = vector.load %arg5[%c0_23, %c2_24, %c0_25, %c0_26] : memref<1x3x2x128xf32, #tpu.memory_space<vmem>>, vector<1x1x2x128xf32>
    %55 = vector.shape_cast %54 : vector<1x1x2x128xf32> to vector<2x128xf32>
    %56 = vector.shape_cast %53 : vector<2x128xf32> to vector<1x1x2x128xf32>
    tpu.vector_store %arg5[%c0_23, %c2_24, %c0_25, %c0_26], %56 {strides = array<i32>} : memref<1x3x2x128xf32, #tpu.memory_space<vmem>>, vector<1x1x2x128xf32>,
    return
  }
  func.func @transform_0(%arg0: i32, %arg1: i32) -> (i32, i32, i32, i32) {
    %c0_i32 = arith.constant 0 : i32
    %c0_i32_0 = arith.constant 0 : i32
    %c0_i32_1 = arith.constant 0 : i32
    return %arg0, %c0_i32, %arg1, %c0_i32_0 : i32, i32, i32, i32
  }
  func.func @transform_1(%arg0: i32, %arg1: i32) -> i32 {
    %c0_i32 = arith.constant 0 : i32
    %c0_i32_0 = arith.constant 0 : i32
    return %c0_i32 : i32
  }
  func.func @transform_2(%arg0: i32, %arg1: i32) -> i32 {
    %c0_i32 = arith.constant 0 : i32
    %c0_i32_0 = arith.constant 0 : i32
    return %c0_i32 : i32
  }
  func.func @transform_3(%arg0: i32, %arg1: i32) -> (i32, i32, i32, i32) {
    %c0_i32 = arith.constant 0 : i32
    %c0_i32_0 = arith.constant 0 : i32
    %c0_i32_1 = arith.constant 0 : i32
    return %arg0, %c0_i32, %arg1, %c0_i32_0 : i32, i32, i32, i32
  }
}

</mosaic_0001>

<bundles_post_ra>
// kernel: tpu_custom_call.1
= control target key start
LH: loop header
LB: loop body
LE: loop exit
PB: predicated region body
PF: predicated region fallthrough
CT: control target
= control target key end

     0   :  { %s874_s0 = inlined_call_operand.hbm [shape: f32[2,3,2,128], index: 0, kind: input, shape index: {}]   ;;  %s875_s1 = inlined_call_operand.hbm [shape: f32[9], index: 1, kind: input, shape index: {}]   ;;  %s876_s2 = inlined_call_operand.vmem [shape: f32[3], index: 2, kind: input, shape index: {}]   ;;  %s877_s3 = inlined_call_operand.hbm [shape: f32[2,3,2,128], index: 3, kind: output, shape index: {}]  }
   0x1   :  { %878 = sst [smem:[#allocation14_spill]] %s875_s1 }
   0x2   :  { %8 = vsyncpa [#allocation3], 0 }
   0x3   :  { %10 = vsyncpa [#allocation3 + $0x1], 0 }
   0x4   :  { %11 = vsyncpa [#allocation5], 0 }
   0x5   :  { %12 = vsyncpa [#allocation6], 0 }
   0x6   :  { %13 = vsyncpa [#allocation4], 0 }
   0x7   :  { %15 = vsyncpa [#allocation4 + $0x1], 0  ;;  %s709_s12 = smov 0   ;;  %s711_s13 = smov 0  }
   0x8   :  { %s713_s14 = smov 0   ;;  %s715_s15 = smov 0  }
   0x9   :  { %s717_s16 = smov 0   ;;  %s719_s17 = smov 0  }
   0xa LB: > { %s413_s18 = sadd.s32 4294967295, %s681_s17   ;;  %s414_s19 = sadd.s32 4294967294, %s681_s17   ;;  %s681_s17 = sphi %s719_s17, %s21_s17   ;;  %s677_s16 = sphi %s717_s16, %s891_s16   ;;  %s673_s15 = sphi %s715_s15, %s890_s15   ;;  %s669_s14 = sphi %s713_s14, %s889_s14   ;;  %s665_s13 = sphi %s711_s13, %s888_s13   ;;  %s661_s12 = sphi %s709_s12, %s887_s12  }
   0xb   : > { %s42_s20 = sadd.s32 1, %s669_s14  ;;  %p49_p0 = scmp.ne.s32.totalorder %s669_s14, %s665_s13 }
   0xc   : > { %p50_p1 = scmp.eq.s32.totalorder %s681_s17, 0  ;;  %p55_p2 = scmp.ne.s32.totalorder %s665_s13, %s661_s12 }
   0xd   : > { %p747_p3 = scmp.eq.s32.totalorder %s413_s18, 0  ;;  %p123_p4 = scmp.eq.s32.totalorder %s413_s18, 1 }
   0xe   : > { %p751_p5 = por %p50_p1, %p49_p0  ;;  %p129_p6 = scmp.eq.s32.totalorder %s414_s19, 1 }
   0xf   : > { %p757_p7 = por %p747_p3, %p55_p2  ;;  %p761_p8 = por %p123_p4, %p49_p0 }
  0x10   : > { %p765_p9 = por %p129_p6, %p55_p2  ;;  %p415_p10 = scmp.ge.s32.totalorder %s681_s17, 1 }
  0x11   : > { %p136_p11 = scmp.lt.s32.totalorder %s681_s17, 3  ;;  %s884_s1 = sld [smem:[#allocation14_spill]] }
  0x12   : > { %p418_p13 = scmp.ge.s32.totalorder %s681_s17, 2  ;;  %p473_p0 = scmp.lt.s32.totalorder %s681_s17, 2 }
  0x13   : > { %p774_p12 = pnand %p415_p10, %p136_p11  ;;  %s158_s5 = sshll.u32 %s876_s2, 4  ;;  %s159_s5 = int_to_ptr.vmem [resolvable:$true] %s158_s5 }
  0x14   : > { %p787_p2 = pnand %p473_p0, %p751_p5  ;;  %s683_s7 = smov [#allocation7]  }
  0x15   : > { %p456_p1 = pneg %p774_p12  ;;  %s684_s8 = smov [#allocation8]  }
  0x16   : > { %s33_s9 = sadd.s32 1, %s677_s16  ;;  %s169_s10 = sand.u32 1, %s669_s14  }
  0x17   : > { %s148_s28 = sshll.u32 %s884_s1, 4  ;;  %p457_p4 = pnand %p456_p1, %p747_p3  ;;  %s149_s28 = int_to_ptr.hbm [resolvable:$true] %s148_s28 }
  0x18   : > { %p35_p6 = scmp.ge.s32.totalorder %s33_s9, 2  ;;  %s440_s11 = smul.u32 6, %s169_s10 }
  0x19   : > { %459 = dma.hbm_to_smem (!%p457_p4), %s149_s28, 16, %s683_s7, [#allocation5]  }
  0x1a   : > { %462 = dma.vmem_to_smem (!%p457_p4), %s159_s5, 16, %s684_s8, [#allocation6]  }
  0x1b   : > { %s893_s9 = smov (%p35_p6, %s33_s9), 0  ;;  %s441_s18 = smul.u32 6, %s677_s16 }
  0x1c   : > { %s37_s19 = ssub.s32 %s677_s16, %s893_s9  ;;  %s173_s22 = scalar_lea.vmem [#allocation2], %s440_s11 }
  0x1d   : > { %s182_s26 = sshll.u32 %s173_s22, 4  ;;  %p40_p5 = scmp.eq.s32.totalorder %s37_s19, 0  ;;  %s183_s26 = int_to_ptr.vmem [resolvable:$true] %s182_s26 }
  0x1e   : > { %s179_s28 = scalar_lea.hbm %s874_s0, %s441_s18  ;;  %s170_s7 = scalar_lea.sflag [#allocation3], %s169_s10 }
  0x1f   : > { %s180_s4 = sshll.u32 %s179_s28, 4  ;;  %s685_s8 = smov 32   ;;  %s181_s4 = int_to_ptr.hbm [resolvable:$true] %s180_s4 }
  0x20   : > { %s806_s5 = scalar_select %p40_p5, %s669_s14, %s42_s20  }
  0x21   : > { %s686_s1 = smov 2   ;;  %194 = sbr.rel (%p774_p12) target bundleno = 74 (0x4a), region = 32 }
  0x22   : > { %466 = dma.hbm_to_vmem [thread:$0]  (!%p787_p2), %s181_s4, 96, %s183_s26, %s170_s7, %s685_s8, %s685_s8, %s686_s1  }
  0x23   : > { %s813_s11 = sand.u32 (!%p774_p12), 1, %s665_s13  }
  0x24   : > { %s442_s18 = smul.u32 (!%p774_p12), 6, %s813_s11  ;;  %s197_s19 = scalar_lea.sflag (!%p774_p12), [#allocation3], %s813_s11 }
  0x26   : > { %s200_s20 = scalar_lea.vmem [#allocation2], %s442_s18 }
  0x27   : > { %644 = dma.done.wait (%p757_p7), %s197_s19, 96  }
  0x28   : > { %646 = vsyncadd (%p757_p7), %s197_s19, 4294967200 }
  0x29   : > { %648 = dma.done.wait (%p747_p3), [#allocation5], 16  }
  0x2a   : > { %650 = vsyncadd (%p747_p3), [#allocation5], 4294967280 }
  0x2b   : > { %652 = dma.done.wait (%p747_p3), [#allocation6], 16  }
  0x2c   : > { %654 = vsyncadd (%p747_p3), [#allocation6], 4294967280 }
  0x2d   : > { %216 = sfence }
  0x2e   : > { %s240_s1 = sld [smem:[#allocation7]]  ;;  %v235_v0 = vld [vmem:[%s200_s20] sm:$0x3]  ;;  %v423_v1 = vld [vmem:[%s200_s20 + $0x2] sm:$0x3]  ;;  %s443_s7 = smul.u32 6, %s673_s15 }
  0x2f   : > { %s425_s29 = sld [smem:[#allocation7 + $0x3]]  ;;  %v424_v2 = vld [vmem:[%s200_s20 + $0x4] sm:$0x3]  ;;  %s234_s8 = scalar_lea.vmem [#allocation9], %s442_s18 }
  0x30   : > { %s426_s6 = sld [smem:[#allocation7 + $0x6]]  ;;  %s301_s15 = sshll.u32 %s234_s8, 4  ;;  %s302_s15 = int_to_ptr.vmem [resolvable:$true] %s301_s15 }
  0x31   : > { %s251_s10 = sld [smem:[#allocation8]]  ;;  %s288_s18 = scalar_lea.sflag [#allocation4], %s813_s11 }
  0x32   : > { %s427_s23 = sld [smem:[#allocation7 + $0x1]] }
  0x33   : > { %s428_s22 = sld [smem:[#allocation7 + $0x4]] }
  0x34   : > { %v241_v3 = vstv %s240_s1  ;;  %s429_s26 = sld [smem:[#allocation7 + $0x7]]  ;;  %s300_s1 = scalar_lea.hbm %s877_s3, %s443_s7 }
  0x35   : > { %v242_v4 = vmul.f32 %v241_v3, %v235_v0  ;;  %v244_v5 = vstv %s425_s29  ;;  %s831_s27 = sld [smem:[#allocation8 + $0x1]]  ;;  %s303_s29 = sshll.u32 %s300_s1, 4  ;;  %s304_s29 = int_to_ptr.hbm [resolvable:$true] %s303_s29 }
  0x36   : > { %v245_v6 = vmul.f32 %v423_v1, %v244_v5  ;;  %v248_v7 = vstv %s426_s6  ;;  %s432_s21 = sld [smem:[#allocation7 + $0x2]]  ;;  %s605_s6 = sshra.s32 %s304_s29, 4  ;;  %s606_s6 = int_to_ptr.hbm [resolvable:$true] %s605_s6 }
  0x37   : > { %v249_v8 = vmul.f32 %v424_v2, %v248_v7  ;;  %s433_s30 = sld [smem:[#allocation7 + $0x5]]  ;;  %v252_v11 = vstv %s251_s10  ;;  %s607_s10 = scalar_lea.hbm %s606_s6, 6 }
  0x38   : > { %v246_v9 = vadd.f32 %v245_v6, %v242_v4  ;;  %v256_v10 = vstv %s427_s23  ;;  %s434_s28 = sld [smem:[#allocation7 + $0x8]]  ;;  %p608_p3 = scmp.ne.s32.totalorder %s606_s6, %s607_s10 }
  0x39   : > { %v257_v12 = vmul.f32 %v256_v10, %v235_v0  ;;  %v259_v13 = vstv %s428_s22  ;;  %s435_s4 = sld [smem:[#allocation8 + $0x2]]  ;;  %p612_p11 = scmp.lt.s32.totalorder %s606_s6, %s877_s3 }
  0x3a   : > { %v250_v14 = vadd.f32 %v249_v8, %v246_v9  ;;  %v260_v15 = vmul.f32 %v423_v1, %v259_v13  ;;  %v263_v16 = vstv %s429_s26  ;;  %p609_p7 = pnand %p608_p3, %p761_p8  ;;  %s611_s26 = scalar_lea.hbm %s877_s3, 12 }
  0x3b   : > { %v264_v17 = vmul.f32 %v424_v2, %v263_v16  ;;  %v267_v21 = vstv %s831_s27  ;;  %p613_p12 = scmp.lt.s32.totalorder %s611_s26, %s607_s10 }
  0x3c   : > { %v253_v18 = vadd.f32 %v252_v11, %v250_v14  ;;  %v261_v19 = vadd.f32 %v260_v15, %v257_v12  ;;  %v272_v20 = vstv %s432_s21  ;;  %p610_p10 = pneg %p609_p7 }
  0x3d   : > { %v273_v22 = vmul.f32 %v272_v20, %v235_v0  ;;  %v275_v23 = vstv %s433_s30  ;;  %p614_p0 = por %p613_p12, %p612_p11 }
  0x3e   : > { %254 = vst [vmem:[%s234_s8] sm:$0x3] %v253_v18  ;;  %v265_v24 = vadd.f32 %v264_v17, %v261_v19  ;;  %v276_v25 = vmul.f32 %v423_v1, %v275_v23  ;;  %v279_v26 = vstv %s434_s28 }
  0x3f   : > { %v280_v27 = vmul.f32 %v424_v2, %v279_v26  ;;  %v283_v30 = vstv %s435_s4  ;;  %p615_p1 = pnand %p614_p0, %p610_p10 }
  0x40   : > { %v268_v28 = vadd.f32 %v267_v21, %v265_v24  ;;  %v277_v29 = vadd.f32 %v276_v25, %v273_v22 }
  0x42   : > { %431 = vst [vmem:[%s234_s8 + $0x2] sm:$0x3] %v268_v28  ;;  %v281_v31 = vadd.f32 %v280_v27, %v277_v29 }
  0x44   : > { %v284_v32 = vadd.f32 %v283_v30, %v281_v31 }
  0x46   : > { %436 = vst [vmem:[%s234_s8 + $0x4] sm:$0x3] %v284_v32 }
  0x47   : > { %618 = shalt.err (!%p615_p1)
}
  0x48   : > { %s687_s11 = smov 32   ;;  %s688_s30 = smov 2  }
  0x49   : > { %454 = dma.vmem_to_hbm [thread:$0]  (%p761_p8), %s302_s15, 96, %s304_s29, %s288_s18, %s687_s11, %s687_s11, %s688_s30  }
  0x4a PF: > { %s318_s28 = sand.u32 1, %s661_s12   ;;  %p468_p2 = pnand %p418_p13, %p765_p9 }
  0x4b   : > { %s319_s4 = scalar_lea.sflag [#allocation4], %s318_s28 }
  0x4c   : > { %p469_p4 = pneg %p468_p2 }
  0x4e   : > { %656 = dma.done.wait (%p469_p4), %s319_s4, 96  }
  0x4f   : > { %658 = vsyncadd (%p469_p4), %s319_s4, 4294967200  ;;  %s21_s17 = sadd.s32 1, %s681_s17   ;;  %s887_s12 = smov %s665_s13 }
  0x50   : > { %p18_p6 = scmp.ge.s32.totalorder %s21_s17, 4   ;;  %s888_s13 = smov %s669_s14 }
  0x51   : > { %s889_s14 = smov %s806_s5  ;;  %s890_s15 = smov %s677_s16 }
  0x52   : > { %s891_s16 = smov %s893_s9  ;;  %20 = sbr.rel (!%p18_p6) target bundleno = 10 (0xa), region = 91 }
  0x57   :  { %325 = vsyncpa [#allocation3], 1 }
  0x58   :  { %327 = vsyncpa [#allocation3 + $0x1], 1 }
  0x59   :  { %328 = vsyncpa [#allocation4], 1 }
  0x5a   :  { %330 = vsyncpa [#allocation4 + $0x1], 1 }
  0x5b   :  { %331 = vsyncpa [#allocation5], 1 }
  0x5c   :  { %333 = vsyncpa [#allocation5 + $0x1], 1 }
  0x5d   :  { %334 = vsyncpa [#allocation6], 1 }
  0x5e   :  { %336 = vsyncpa [#allocation6 + $0x1], 1 }

</bundles_post_ra>
